<compile_context>
chip_gen: v5e
topology: v5e:2x2
jax: 0.10.0
libtpu: 0.0.40
codegen_flags: <defaults>
</compile_context>

<pallas_src>
import functools

import jax
import jax.numpy as jnp
from jax.experimental import pallas as pl
from jax.experimental.pallas import tpu as pltpu

_LANE = 128
_IN_ROW_BYTES = _LANE * 4            # (tm, g<128) int32 index block pads to 128 lanes
_PIPELINE_BUDGET = 24 * 1024 * 1024  # all double-buffered in+out blocks
_VMEM_LIMIT = 48 * 1024 * 1024       # scoped VMEM limit (safe on v5e/v6e/v7x)


def _one_hot_kernel(t_ref, o_ref, *, g):
    # t_ref: (TM, g)  int32   -- target column(s) per folded output row
    # o_ref: (TM, TN) float32 -- one-hot slab for lane block pl.program_id(1)
    tn = o_ref.shape[1]
    col0 = pl.program_id(1) * tn     # scalar; 0 whenever grid_n == 1
    cols = jax.lax.broadcasted_iota(jnp.int32, o_ref.shape, 1)
    # Subtract col0 from the narrow (TM,1) target column (cheap) rather than
    # adding it to the whole (TM,TN) iota: one less full-tile VALU op / vreg.
    m = cols == (t_ref[:, 0:1] - col0)
    for s in range(1, g):            # static unroll; g <= 8
        m = m | (cols == (t_ref[:, s:s + 1] - col0))
    o_ref[...] = m.astype(jnp.float32)


def _fold_factor(n, d):
    """Samples folded per 128-lane output row (lane-dense output for small vocabs)."""
    if d >= _LANE or _LANE % d != 0:
        return 1
    g = _LANE // d
    if g > 8:                        # keep per-output-vreg VALU work bounded
        return 1
    if g == 2 and n % 2 != 0:        # tail-slice copy would outweigh the 2x lane win
        return 1
    return g


def _choose_tiles(n_rows, width):
    """(tm, tn) sized from the VMEM pipeline budget (incl. lane-padded index block)."""
    # Prefer full-width tiles (grid_n == 1): contiguous HBM writeback, no col0 path.
    max_row_bytes = _PIPELINE_BUDGET // (2 * 8)        # >= 8 rows, double-buffered
    if width * 4 + _IN_ROW_BYTES <= max_row_bytes:
        tn = width
    else:
        tn = ((max_row_bytes - _IN_ROW_BYTES) // 4 // _LANE) * _LANE
    row_bytes = 2 * (tn * 4 + _IN_ROW_BYTES)           # 2x (out block + padded in block)
    tm = max(8, (_PIPELINE_BUDGET // row_bytes) // 8 * 8)
    tm = min(tm, max(8, ((n_rows + 7) // 8) * 8))
    return tm, tn


@functools.partial(jax.jit, static_argnames=("input_size",))
def embedding_one_hot(x, *, input_size):
    """One-hot encode `x` (shape (N,), int) -> (N, input_size) float32."""
    x = x.astype(jnp.int32)
    n = x.shape[0]

    g = _fold_factor(n, input_size)
    width = g * input_size                 # lane width of the kernel output
    n_rows = -(-n // g)                    # folded rows covering all samples

    tm, tn = _choose_tiles(n_rows, width)
    grid_m = pl.cdiv(n_rows, tm)
    grid_n = pl.cdiv(width, tn)

    # Pad only the tiny int32 index vector; the float32 kernel output is never
    # padded (Pallas masks ragged edge blocks), so the g == 1 path has no
    # post-kernel copy at all.
    n_pad = grid_m * tm * g
    xp = jnp.pad(x, (0, n_pad - n))
    if g > 1:
        # Target column inside the folded 128-lane row: (i % g)*d + x[i].
        # Out-of-range / negative indices map to -1 -> all-zero row.
        seg = (jnp.arange(n_pad, dtype=jnp.int32) % g) * input_size
        t = jnp.where((xp >= 0) & (xp < input_size), seg + xp, -1)
    else:
        t = xp
    t2d = t.reshape(grid_m * tm, g)

    out = pl.pallas_call(
        functools.partial(_one_hot_kernel, g=g),
        out_shape=jax.ShapeDtypeStruct((n_rows, width), jnp.float32),
        grid_spec=pltpu.PrefetchScalarGridSpec(
            num_scalar_prefetch=0,
            grid=(grid_m, grid_n),
            in_specs=[pl.BlockSpec((tm, g), lambda i, j: (i, 0))],
            out_specs=pl.BlockSpec((tm, tn), lambda i, j: (i, j)),
        ),
        compiler_params=pltpu.CompilerParams(
            # Rows are the axis to shard across v7x's 2 TensorCores.
            dimension_semantics=("parallel", "arbitrary"),
            vmem_limit_bytes=_VMEM_LIMIT,
        ),
        cost_estimate=pl.CostEstimate(
            flops=n * input_size,
            transcendentals=0,
            bytes_accessed=n * input_size * 4 + n * 4,
        ),
    )(t2d)

    if g > 1:
        # (n_rows, g*d) -> (n_rows*g, d) is a free row-major reshape; the [:n]
        # slice is a no-op when n % g == 0.
        out = out.reshape(n_rows * g, input_size)[:n]
    return out


class EmbeddingOneHot:
    """JAX/Pallas port of deepcase EmbeddingOneHot (no learned parameters)."""

    def __init__(self, input_size):
        self.input_size = input_size
        self.embedding_dim = input_size

    def __call__(self, X):
        return embedding_one_hot(X, input_size=self.input_size)


if __name__ == "__main__":
    key = jax.random.PRNGKey(0)

    # --- Small demo consistent with the module (8 events, vocab 32). ---
    # d = 32 < 128 -> folded lane-dense path (g = 4, 128-lane output rows).
    input_size = 32
    n_samples = 8
    X = jax.random.randint(key, (n_samples,), 0, input_size, dtype=jnp.int32)
    module = EmbeddingOneHot(input_size)
    out = jax.block_until_ready(module(X))
    ref = jax.nn.one_hot(X, input_size, dtype=jnp.float32)
    assert out.shape == (n_samples, input_size), out.shape
    assert out.dtype == jnp.float32, out.dtype
    assert bool(jnp.all(out == ref)), "mismatch (folded path, aligned n)"

    # --- Folded path with a ragged tail (n % g != 0 -> reshape + slice). ---
    X2 = jax.random.randint(jax.random.PRNGKey(0), (13,), 0, input_size,
                            dtype=jnp.int32)
    out2 = jax.block_until_ready(module(X2))
    ref2 = jax.nn.one_hot(X2, input_size, dtype=jnp.float32)
    assert out2.shape == (13, input_size), out2.shape
    assert bool(jnp.all(out2 == ref2)), "mismatch (folded path, ragged n)"

    # --- Wide vocab: full-width tiles (grid_n == 1), ragged rows masked. ---
    input_size3 = 4608
    n_samples3 = 300
    X3 = jax.random.randint(jax.random.PRNGKey(0), (n_samples3,), 0, input_size3,
                            dtype=jnp.int32)
    module3 = EmbeddingOneHot(input_size3)
    out3 = jax.block_until_ready(module3(X3))
    ref3 = jax.nn.one_hot(X3, input_size3, dtype=jnp.float32)
    assert out3.shape == (n_samples3, input_size3), out3.shape
    assert bool(jnp.all(out3 == ref3)), "mismatch (full-width path)"

    print("KERNEL_OK")
</pallas_src>

<mosaic_0001>
module attributes {stable_mosaic.version = 11 : i64} {
  func.func @_one_hot_kernel(%arg0: i32, %arg1: i32, %arg2: memref<8x4xi32, #tpu.memory_space<vmem>>, %arg3: memref<8x128xf32, #tpu.memory_space<vmem>>) attributes {dimension_semantics = [#tpu.dimension_semantics<parallel>, #tpu.dimension_semantics<arbitrary>], iteration_bounds = array<i64: 1, 1>, scalar_prefetch = 0 : i64, scratch_operands = 0 : i64, tpu.core_type = #tpu.core_type<tc>, window_params = [{transform_indices = @transform_0, window_bounds = array<i64: 8, 4>}, {transform_indices = @transform_1, window_bounds = array<i64: 8, 128>}]} {
    %c128_i32 = arith.constant 128 : i32
    %0 = arith.muli %arg1, %c128_i32 : i32
    %1 = tpu.iota {dimensions = array<i32: 1>} : vector<8x128xi32>
    %c0 = arith.constant 0 : index
    %c0_0 = arith.constant 0 : index
    %2 = vector.load %arg2[%c0, %c0_0] : memref<8x4xi32, #tpu.memory_space<vmem>>, vector<8x1xi32>
    %3 = vector.broadcast %0 : i32 to vector<8x1xi32>
    %4 = arith.subi %2, %3 : vector<8x1xi32>
    %5 = vector.broadcast %4 : vector<8x1xi32> to vector<8x128xi32>
    %6 = arith.cmpi eq, %1, %5 : vector<8x128xi32>
    %c0_1 = arith.constant 0 : index
    %c1 = arith.constant 1 : index
    %7 = vector.load %arg2[%c0_1, %c1] : memref<8x4xi32, #tpu.memory_space<vmem>>, vector<8x1xi32>
    %8 = vector.broadcast %0 : i32 to vector<8x1xi32>
    %9 = arith.subi %7, %8 : vector<8x1xi32>
    %10 = vector.broadcast %9 : vector<8x1xi32> to vector<8x128xi32>
    %11 = arith.cmpi eq, %1, %10 : vector<8x128xi32>
    %12 = arith.ori %6, %11 : vector<8x128xi1>
    %c0_2 = arith.constant 0 : index
    %c2 = arith.constant 2 : index
    %13 = vector.load %arg2[%c0_2, %c2] : memref<8x4xi32, #tpu.memory_space<vmem>>, vector<8x1xi32>
    %14 = vector.broadcast %0 : i32 to vector<8x1xi32>
    %15 = arith.subi %13, %14 : vector<8x1xi32>
    %16 = vector.broadcast %15 : vector<8x1xi32> to vector<8x128xi32>
    %17 = arith.cmpi eq, %1, %16 : vector<8x128xi32>
    %18 = arith.ori %12, %17 : vector<8x128xi1>
    %c0_3 = arith.constant 0 : index
    %c3 = arith.constant 3 : index
    %19 = vector.load %arg2[%c0_3, %c3] : memref<8x4xi32, #tpu.memory_space<vmem>>, vector<8x1xi32>
    %20 = vector.broadcast %0 : i32 to vector<8x1xi32>
    %21 = arith.subi %19, %20 : vector<8x1xi32>
    %22 = vector.broadcast %21 : vector<8x1xi32> to vector<8x128xi32>
    %23 = arith.cmpi eq, %1, %22 : vector<8x128xi32>
    %24 = arith.ori %18, %23 : vector<8x128xi1>
    %25 = arith.extui %24 : vector<8x128xi1> to vector<8x128xi32>
    %26 = arith.sitofp %25 : vector<8x128xi32> to vector<8x128xf32>
    %c0_4 = arith.constant 0 : index
    %c0_5 = arith.constant 0 : index
    %27 = vector.load %arg3[%c0_4, %c0_5] : memref<8x128xf32, #tpu.memory_space<vmem>>, vector<8x128xf32>
    tpu.vector_store %arg3[%c0_4, %c0_5], %26 {strides = array<i32>} : memref<8x128xf32, #tpu.memory_space<vmem>>, vector<8x128xf32>,
    return
  }
  func.func @transform_0(%arg0: i32, %arg1: i32) -> (i32, i32) {
    %c0_i32 = arith.constant 0 : i32
    %c0_i32_0 = arith.constant 0 : i32
    return %arg0, %c0_i32 : i32, i32
  }
  func.func @transform_1(%arg0: i32, %arg1: i32) -> (i32, i32) {
    %c0_i32 = arith.constant 0 : i32
    return %arg0, %arg1 : i32, i32
  }
}

</mosaic_0001>

<bundles_post_ra>
// kernel: embedding_one_hot.1
= control target key start
LH: loop header
LB: loop body
LE: loop exit
PB: predicated region body
PF: predicated region fallthrough
CT: control target
= control target key end

     0   :  { %v88_v1 = vmov 0   ;;  %v89_v2 = vmov 2   ;;  %v90_v3 = vmov 1   ;;  %v91_v4 = vmov 3   ;;  %s109_s0 = inlined_call_operand.vmem [shape: s32[8,4], index: 0, kind: input, shape index: {}]   ;;  %s110_s1 = inlined_call_operand.vmem [shape: f32[2,128], index: 1, kind: output, shape index: {}]  }
   0x1   :  { %v11_v0 = vld [vmem:[%s109_s0] sm:$0xff]  ;;  %83 = vset.pattern.permute.xlu0 %v88_v1  ;;  %85 = vset.pattern.permute.xlu1 %v89_v2  ;;  %v9_v7 = vlaneseq  ;;  %v92_v11 = vmov 0.0  }
   0x2   :  { %15 = vperm.xlu0 %83, %v11_v0   ;;  %24 = vperm.xlu1 %85, %v11_v0  }
   0x3   :  { %v10_v8 = vand.u32 127, %v9_v7 }
   0xa   :  { %84 = vset.pattern.permute.xlu0 %v90_v3  ;;  %86 = vset.pattern.permute.xlu1 %v91_v4 }
   0xb   :  { %19 = vperm.xlu0 %84, %v11_v0   ;;  %29 = vperm.xlu1 %86, %v11_v0  }
  0x13   :  { %87 = vset.pattern.permute.xlu0 %v91_v4 }
  0x74   :  { %v16_v5 = vpop.permute.xlu0 %15  ;;  %v25_v6 = vpop.permute.xlu1 %24 }
  0x75   :  { %vm17_vm0 = vcmp.eq.s32.totalorder %v10_v8, %v16_v5  ;;  %vm26_vm3 = vcmp.eq.s32.totalorder %v10_v8, %v25_v6 }
  0x7d   :  { %v20_v9 = vpop.permute.xlu0 %19  ;;  %v30_v10 = vpop.permute.xlu1 %29 }
  0x7e   :  { %vm21_vm1 = vcmp.eq.s32.totalorder %v10_v8, %v20_v9  ;;  %vm31_vm2 = vcmp.eq.s32.totalorder %v10_v8, %v30_v10 }
  0x7f   :  { %vm22_vm4 = vmor %vm17_vm0, %vm21_vm1 }
  0x80   :  { %vm27_vm5 = vmor %vm22_vm4, %vm26_vm3 }
  0x81   :  { %vm32_vm6 = vmor %vm27_vm5, %vm31_vm2 }
  0x82   :  { %v77_v12 = vsel %vm32_vm6, 1.0, %v92_v11 }
  0x83   :  { %35 = vst [vmem:[#allocation2] sm:$0xff] %v77_v12 }
  0x8a   :  { %v54_v13 = vld [vmem:[#allocation2] sm:$0x3] }
  0x8b   :  { %55 = vst [vmem:[%s110_s1] sm:$0x3] %v54_v13 }

</bundles_post_ra>
